<compile_context>
chip_gen: v7x
topology: tpu7x:2x2x1
jax: 0.10.0
libtpu: 0.0.40
codegen_flags: <defaults>
</compile_context>

<pallas_src>
import functools

import jax
import jax.numpy as jnp
from jax.experimental import pallas as pl
from jax.experimental.pallas import tpu as pltpu


def _round_up(x, m):
    return -(-x // m) * m


# --------------------------------------------------------------------------- kernels
def _matmul_kernel(a_ref, b_ref, o_ref, acc_ref):
    @pl.when(pl.program_id(2) == 0)
    def _():
        acc_ref[...] = jnp.zeros_like(acc_ref)

    acc_ref[...] += jnp.dot(a_ref[...], b_ref[...],
                            preferred_element_type=jnp.float32)

    @pl.when(pl.program_id(2) == pl.num_programs(2) - 1)
    def _():
        o_ref[...] = acc_ref[...].astype(o_ref.dtype)


def _matmul_bias_kernel(a_ref, b_ref, bias_ref, o_ref, acc_ref):
    @pl.when(pl.program_id(2) == 0)
    def _():
        acc_ref[...] = bias_ref[...].astype(jnp.float32)

    acc_ref[...] += jnp.dot(a_ref[...], b_ref[...],
                            preferred_element_type=jnp.float32)

    @pl.when(pl.program_id(2) == pl.num_programs(2) - 1)
    def _():
        o_ref[...] = acc_ref[...].astype(o_ref.dtype)


# ---------------------------------------------------------------- tiling / VMEM logic
def _vmem_capacity_bytes():
    try:
        cap = int(pltpu.get_tpu_info().vmem_capacity_bytes)
        if cap > 0:
            return cap
    except Exception:
        pass
    return 64 * 1024 * 1024  # conservative default (v7x-sized)


def _pick_tiles(M, K, N, a_isz, b_isz, out_isz, has_bias, budget, sublane_pack):
    """Pick (TM, TK, TN). Tiles are either the full (possibly small/odd) dim or a
    128-aligned (TM: sublane-pack-aligned) size; the double-buffered working set must
    fit `budget` and real padded HBM traffic is minimized."""
    def cands(dim, prefs, full_cap):
        c = [dim] if dim <= full_cap else []
        c += [p for p in prefs if p < dim]
        return c or [dim]

    tm_prefs = tuple(t for t in (1024, 512, 256, 128, 64, 32, 16, 8)
                     if t % sublane_pack == 0)
    tkn_prefs = (2048, 1024, 512, 256, 128)

    best_key, best = None, None
    for tm in cands(M, tm_prefs, 1024):
        for tk in cands(K, tkn_prefs, 2048):
            for tn in cands(N, tkn_prefs, 2048):
                mp, kp, np_ = _round_up(M, tm), _round_up(K, tk), _round_up(N, tn)
                ws = 2 * (tm * tk * a_isz + tk * tn * b_isz + tm * tn * out_isz)
                ws += tm * tn * 4                    # f32 accumulator scratch
                if has_bias:
                    ws += 2 * tm * tn * 4
                traffic = (mp * kp * (np_ // tn) * a_isz   # A re-read per lane tile
                           + kp * np_ * (mp // tm) * b_isz  # B re-read per row tile
                           + mp * np_ * out_isz
                           + (mp * np_ * 4 if has_bias else 0))
                key = (0, traffic, -(tm * tk * tn)) if ws <= budget else (1, ws, 0)
                if best_key is None or key < best_key:
                    best_key, best = key, (tm, tk, tn)
    return best


def _pad2(x, rows, cols):
    pr, pc = rows - x.shape[0], cols - x.shape[1]
    if pr == 0 and pc == 0:
        return x
    return jnp.pad(x, ((0, pr), (0, pc)))


# --------------------------------------------------------------- generic tiled matmul
def pallas_matmul(a, b, bias=None, *, compute_dtype=jnp.bfloat16,
                  out_dtype=jnp.float32, tiles=None,
                  vmem_budget=None, vmem_limit=None):
    """out = a @ b (+ bias); MXU matmul with f32 accumulation, K-tiled grid."""
    M, K = a.shape
    K2, N = b.shape
    assert K == K2, (a.shape, b.shape)
    if bias is not None:
        assert bias.shape == (M, N), bias.shape

    cap = _vmem_capacity_bytes()
    if vmem_budget is None:
        vmem_budget = int(cap * 0.60)
    if vmem_limit is None:
        vmem_limit = int(cap * 0.85)

    a_isz = jnp.dtype(compute_dtype).itemsize
    out_isz = jnp.dtype(out_dtype).itemsize
    sub_pack = 16 if a_isz < 4 else 8

    if tiles is None:
        tm, tk, tn = _pick_tiles(M, K, N, a_isz, a_isz, out_isz,
                                 bias is not None, vmem_budget, sub_pack)
    else:
        tm, tk, tn = tiles

    Mp, Kp, Np = _round_up(M, tm), _round_up(K, tk), _round_up(N, tn)
    a_p = _pad2(a.astype(compute_dtype), Mp, Kp)
    b_p = _pad2(b.astype(compute_dtype), Kp, Np)
    operands = [a_p, b_p]
    in_specs = [
        pl.BlockSpec((tm, tk), lambda i, j, k: (i, k)),
        pl.BlockSpec((tk, tn), lambda i, j, k: (k, j)),
    ]
    if bias is not None:
        operands.append(_pad2(bias.astype(jnp.float32), Mp, Np))
        in_specs.append(pl.BlockSpec((tm, tn), lambda i, j, k: (i, j)))
        kernel = _matmul_bias_kernel
    else:
        kernel = _matmul_kernel

    grid = (Mp // tm, Np // tn, Kp // tk)
    bytes_accessed = (Mp * Kp * (Np // tn) * a_isz
                      + Kp * Np * (Mp // tm) * a_isz
                      + Mp * Np * out_isz
                      + (Mp * Np * 4 if bias is not None else 0))

    out = pl.pallas_call(
        kernel,
        out_shape=jax.ShapeDtypeStruct((Mp, Np), out_dtype),
        grid_spec=pltpu.PrefetchScalarGridSpec(
            num_scalar_prefetch=0,
            grid=grid,
            in_specs=in_specs,
            out_specs=pl.BlockSpec((tm, tn), lambda i, j, k: (i, j)),
            scratch_shapes=[pltpu.VMEM((tm, tn), jnp.float32)],
        ),
        compiler_params=pltpu.CompilerParams(
            dimension_semantics=("parallel", "parallel", "arbitrary"),
            vmem_limit_bytes=vmem_limit,
        ),
        cost_estimate=pl.CostEstimate(
            flops=2 * Mp * Kp * Np, transcendentals=0,
            bytes_accessed=bytes_accessed),
    )(*operands)

    if Mp != M or Np != N:
        out = out[:M, :N]
    return out


# -------------------------------------------------------------- GraphConvolution fwd
def graph_convolution(inp, dad, weight, bias=None, *, compute_dtype=jnp.bfloat16):
    """inp: (B, N, Fin); dad: (N, N); weight: (Fout, Fin); bias: (N, Fout) or None.
    Returns (B, N, Fout) float32, matching the PyTorch module's forward."""
    B, N, Fin = inp.shape
    Fout, Fin_w = weight.shape
    assert Fin_w == Fin, (Fin_w, Fin)
    assert dad.shape == (N, N)
    if bias is not None:
        assert bias.shape == (N, Fout)

    wt = weight.T  # (Fin, Fout)
    mm = functools.partial(pallas_matmul, compute_dtype=compute_dtype)

    if Fout <= Fin:
        # Feature transform first (cheaper aggregation), batch folded into M then
        # into the aggregation's lane dim -> DAD read once, lane-dense stores.
        h = mm(inp.reshape(B * N, Fin), wt, out_dtype=compute_dtype)      # (B*N, Fout)
        h2 = h.reshape(B, N, Fout).transpose(1, 0, 2).reshape(N, B * Fout)
        bias2 = None if bias is None else jnp.tile(bias, (1, B))          # (N, B*Fout)
        y2 = mm(dad, h2, bias2, out_dtype=jnp.float32)                    # (N, B*Fout)
        out = y2.reshape(N, B, Fout).transpose(1, 0, 2)                   # (B, N, Fout)
    else:
        # Aggregate first, batch folded into the lane dim, then into M.
        x2 = inp.transpose(1, 0, 2).reshape(N, B * Fin)                   # (N, B*Fin)
        ax2 = mm(dad, x2, out_dtype=compute_dtype)                        # (N, B*Fin)
        ax_flat = ax2.reshape(N * B, Fin)
        bias_rep = None if bias is None else jnp.repeat(bias, B, axis=0)  # (N*B, Fout)
        y = mm(ax_flat, wt, bias_rep, out_dtype=jnp.float32)              # (N*B, Fout)
        out = y.reshape(N, B, Fout).transpose(1, 0, 2)                    # (B, N, Fout)
    return out


# ----------------------------------------------------------------------------- tests
if __name__ == "__main__":
    def reference(x, dad, weight, bias):
        ax = jnp.einsum("nm,bmf->bnf", dad, x)
        out = jnp.einsum("bnf,of->bno", ax, weight)
        return out if bias is None else out + bias[None]

    def make_inputs(key, batch, node_size, in_features, out_features):
        # Small-integer inputs keep every path (f32 / bf16 operands, f32 MXU
        # accumulation, XLA reference) bit-exact, so checks can be tight without
        # depending on the backend's default matmul precision.
        kd, kx, kw, kb = jax.random.split(key, 4)
        x = jax.random.randint(kx, (batch, node_size, in_features), -1, 2).astype(jnp.float32)
        w = jax.random.randint(kw, (out_features, in_features), -1, 2).astype(jnp.float32)
        b = jax.random.randint(kb, (node_size, out_features), -1, 2).astype(jnp.float32)
        dad = jax.random.randint(kd, (node_size, node_size), 0, 2).astype(jnp.float32)
        return x, dad, w, b

    key = jax.random.PRNGKey(0)
    k1, k2, k3, k4 = jax.random.split(key, 4)

    # 1) Fin < Fout -> aggregate-first path (f32 compute), with bias.
    x, dad, w, b = make_inputs(k1, batch=2, node_size=16, in_features=8, out_features=32)
    out = jax.block_until_ready(graph_convolution(x, dad, w, b, compute_dtype=jnp.float32))
    ref = reference(x, dad, w, b)
    assert out.shape == ref.shape, out.shape
    assert jnp.allclose(out, ref, atol=1e-5, rtol=1e-5), "agg-first path mismatch"

    # 2) Fout < Fin -> feature-first path (f32 compute), no bias.
    x, dad, w, _ = make_inputs(k2, batch=2, node_size=32, in_features=64, out_features=16)
    out = jax.block_until_ready(graph_convolution(x, dad, w, None, compute_dtype=jnp.float32))
    ref = reference(x, dad, w, None)
    assert jnp.allclose(out, ref, atol=1e-5, rtol=1e-5), "feat-first path mismatch"

    # 3) Default bf16-operand / f32-accumulate path with bias (values stay exact).
    x, dad, w, b = make_inputs(k3, batch=2, node_size=32, in_features=64, out_features=16)
    out = jax.block_until_ready(graph_convolution(x, dad, w, b))
    ref = reference(x, dad, w, b)
    assert jnp.allclose(out, ref, atol=1e-5, rtol=1e-5), "bf16 path mismatch"

    # 4) Generic kernel with forced small tiles: multi-tile grid, K accumulation,
    #    zero-padding of K and the lane dim, bias init.
    ka, kb2, kbias = jax.random.split(k4, 3)
    A = jax.random.randint(ka, (96, 320), -1, 2).astype(jnp.float32)
    Bm = jax.random.randint(kb2, (320, 192), -1, 2).astype(jnp.float32)
    bias_t = jax.random.randint(kbias, (96, 192), -1, 2).astype(jnp.float32)
    got = jax.block_until_ready(
        pallas_matmul(A, Bm, bias_t, compute_dtype=jnp.bfloat16, tiles=(32, 128, 128)))
    want = A @ Bm + bias_t
    assert jnp.allclose(got, want, atol=1e-5, rtol=1e-5), "tiled matmul mismatch"

    print("KERNEL_OK")
</pallas_src>

<mosaic_0001>
module attributes {stable_mosaic.version = 11 : i64} {
  func.func @_matmul_kernel(%arg0: i32, %arg1: i32, %arg2: i32, %arg3: memref<16x16xf32, #tpu.memory_space<vmem>>, %arg4: memref<16x16xf32, #tpu.memory_space<vmem>>, %arg5: memref<16x16xf32, #tpu.memory_space<vmem>>, %arg6: memref<16x16xf32, #tpu.memory_space<vmem>>) attributes {dimension_semantics = [#tpu.dimension_semantics<parallel>, #tpu.dimension_semantics<parallel>, #tpu.dimension_semantics<arbitrary>], iteration_bounds = array<i64: 1, 1, 1>, scalar_prefetch = 0 : i64, scratch_operands = 1 : i64, tpu.core_type = #tpu.core_type<tc>, window_params = [{transform_indices = @transform_0, window_bounds = array<i64: 16, 16>}, {transform_indices = @transform_1, window_bounds = array<i64: 16, 16>}, {transform_indices = @transform_2, window_bounds = array<i64: 16, 16>}]} {
    %c0_i32 = arith.constant 0 : i32
    %0 = arith.cmpi eq, %arg2, %c0_i32 : i32
    %1 = arith.extui %0 : i1 to i32
    %c0_i32_0 = arith.constant 0 : i32
    %2 = arith.cmpi ne, %1, %c0_i32_0 : i32
    scf.if %2 {
      %cst_10 = arith.constant 0.000000e+00 : f32
      %12 = vector.broadcast %cst_10 : f32 to vector<16x16xf32>
      %c0_11 = arith.constant 0 : index
      %c0_12 = arith.constant 0 : index
      %13 = vector.load %arg6[%c0_11, %c0_12] : memref<16x16xf32, #tpu.memory_space<vmem>>, vector<16x16xf32>
      tpu.vector_store %arg6[%c0_11, %c0_12], %12 {strides = array<i32>} : memref<16x16xf32, #tpu.memory_space<vmem>>, vector<16x16xf32>,
    } else {
    }
    %c0 = arith.constant 0 : index
    %c0_1 = arith.constant 0 : index
    %3 = vector.load %arg6[%c0, %c0_1] : memref<16x16xf32, #tpu.memory_space<vmem>>, vector<16x16xf32>
    %c0_2 = arith.constant 0 : index
    %c0_3 = arith.constant 0 : index
    %4 = vector.load %arg3[%c0_2, %c0_3] : memref<16x16xf32, #tpu.memory_space<vmem>>, vector<16x16xf32>
    %c0_4 = arith.constant 0 : index
    %c0_5 = arith.constant 0 : index
    %5 = vector.load %arg4[%c0_4, %c0_5] : memref<16x16xf32, #tpu.memory_space<vmem>>, vector<16x16xf32>
    %cst = arith.constant dense<0.000000e+00> : vector<16x16xf32>
    %6 = tpu.matmul %4, %5, %cst {dimension_numbers = #tpu.dot_dimension_numbers<[1], [0], [0], [1], [0, 0, 1, 1], [], []>} : vector<16x16xf32>, vector<16x16xf32>, vector<16x16xf32> -> vector<16x16xf32>
    %7 = arith.addf %3, %6 : vector<16x16xf32>
    %c0_6 = arith.constant 0 : index
    %c0_7 = arith.constant 0 : index
    %8 = vector.load %arg6[%c0_6, %c0_7] : memref<16x16xf32, #tpu.memory_space<vmem>>, vector<16x16xf32>
    tpu.vector_store %arg6[%c0_6, %c0_7], %7 {strides = array<i32>} : memref<16x16xf32, #tpu.memory_space<vmem>>, vector<16x16xf32>,
    %c0_i32_8 = arith.constant 0 : i32
    %9 = arith.cmpi eq, %arg2, %c0_i32_8 : i32
    %10 = arith.extui %9 : i1 to i32
    %c0_i32_9 = arith.constant 0 : i32
    %11 = arith.cmpi ne, %10, %c0_i32_9 : i32
    scf.if %11 {
      %c0_10 = arith.constant 0 : index
      %c0_11 = arith.constant 0 : index
      %12 = vector.load %arg6[%c0_10, %c0_11] : memref<16x16xf32, #tpu.memory_space<vmem>>, vector<16x16xf32>
      %c0_12 = arith.constant 0 : index
      %c0_13 = arith.constant 0 : index
      %13 = vector.load %arg5[%c0_12, %c0_13] : memref<16x16xf32, #tpu.memory_space<vmem>>, vector<16x16xf32>
      tpu.vector_store %arg5[%c0_12, %c0_13], %12 {strides = array<i32>} : memref<16x16xf32, #tpu.memory_space<vmem>>, vector<16x16xf32>,
    } else {
    }
    return
  }
  func.func @transform_0(%arg0: i32, %arg1: i32, %arg2: i32) -> (i32, i32) {
    %c0_i32 = arith.constant 0 : i32
    return %arg0, %arg2 : i32, i32
  }
  func.func @transform_1(%arg0: i32, %arg1: i32, %arg2: i32) -> (i32, i32) {
    %c0_i32 = arith.constant 0 : i32
    return %arg2, %arg1 : i32, i32
  }
  func.func @transform_2(%arg0: i32, %arg1: i32, %arg2: i32) -> (i32, i32) {
    %c0_i32 = arith.constant 0 : i32
    return %arg0, %arg1 : i32, i32
  }
}

</mosaic_0001>

<bundles_post_ra>
// kernel: tpu_custom_call.1
= control target key start
LH: loop header
LB: loop body
LE: loop exit
PB: predicated region body
PF: predicated region fallthrough
CT: control target
= control target key end

     0   :  { %7 = vsyncpa [#allocation4], 0  ;;  %s333_s0 = inlined_call_operand.hbm [shape: f32[16,16], index: 0, kind: input, shape index: {}]   ;;  %s334_s1 = inlined_call_operand.hbm [shape: f32[16,16], index: 1, kind: input, shape index: {}]   ;;  %s335_s2 = inlined_call_operand.hbm [shape: f32[16,16], index: 2, kind: output, shape index: {}]  }
   0x1   :  { %8 = vsyncpa [#allocation7], 0 }
   0x2   :  { %9 = vsyncpa [#allocation5], 0  ;;  %s259_s9 = smov [#allocation3]   ;;  %s187_s13 = scalar_lea.hbm %s333_s0, 256 }
   0x3   :  { %s15_s10 = sshll.u32 %s259_s9, 4  ;;  %p188_p0 = scmp.ne.s32.totalorder %s333_s0, %s187_s13  ;;  %s16_s10 = int_to_ptr.vmem [resolvable:$true] %s15_s10 }
   0x4   :  { %p191_p1 = scmp.lt.u32.totalorder %s187_s13, %s333_s0 }
   0x6   :  { %p193_p2 = pnand %p191_p1, %p188_p0 }
   0x8   :  { %196 = shalt.err (!%p193_p2)
}
   0x9   :  { %s197_s18 = scalar_lea.vmem %s16_s10, 256  ;;  %p202_p4 = scmp.lt.s32.totalorder %s16_s10, %s16_s10 }
   0xa   :  { %p198_p3 = scmp.ne.s32.totalorder %s16_s10, %s197_s18  ;;  %p203_p5 = scmp.lt.s32.totalorder %s197_s18, %s197_s18 }
   0xc   :  { %p204_p6 = por %p203_p5, %p202_p4 }
   0xe   :  { %p205_p7 = pnand %p204_p6, %p198_p3 }
  0x10   :  { %208 = shalt.err (!%p205_p7)
}
  0x11   :  { %s260_s19 = smov 128   ;;  %s261_s20 = smov 8  }
  0x12   :  { %21 = dma.hbm_to_vmem [thread:$0]  %s333_s0, 256, %s16_s10, [#allocation4], %s260_s19, %s260_s19, %s261_s20  }
  0x13   :  { %s262_s23 = smov [#allocation6]   ;;  %s209_s27 = scalar_lea.hbm %s334_s1, 256 }
  0x14   :  { %s27_s24 = sshll.u32 %s262_s23, 4  ;;  %p210_p8 = scmp.ne.s32.totalorder %s334_s1, %s209_s27  ;;  %s28_s24 = int_to_ptr.vmem [resolvable:$true] %s27_s24 }
  0x15   :  { %p213_p9 = scmp.lt.u32.totalorder %s209_s27, %s334_s1 }
  0x17   :  { %p215_p10 = pnand %p213_p9, %p210_p8 }
  0x19   :  { %218 = shalt.err (!%p215_p10)
}
  0x1a   :  { %s219_s4 = scalar_lea.vmem %s28_s24, 256  ;;  %p224_p12 = scmp.lt.s32.totalorder %s28_s24, %s28_s24 }
  0x1b   :  { %p220_p11 = scmp.ne.s32.totalorder %s28_s24, %s219_s4  ;;  %p225_p13 = scmp.lt.s32.totalorder %s219_s4, %s219_s4 }
  0x1d   :  { %p226_p0 = por %p225_p13, %p224_p12 }
  0x1f   :  { %p227_p1 = pnand %p226_p0, %p220_p11 }
  0x21   :  { %230 = shalt.err (!%p227_p1)
}
  0x22   :  { %33 = dma.hbm_to_vmem [thread:$0]  %s334_s1, 256, %s28_s24, [#allocation7], %s260_s19, %s260_s19, %s261_s20  }
  0x23   :  { %253 = dma.done.wait [#allocation4], 256  }
  0x24   :  { %254 = vsyncadd [#allocation4], 4294967040 }
  0x25   :  { %255 = dma.done.wait [#allocation7], 256  }
  0x26   :  { %256 = vsyncadd [#allocation7], 4294967040  ;;  %vm44_vm0 = vcmask 130048   ;;  %v263_v0 = vmov 0.0   ;;  %v51_v1 = vld [vmem:[#allocation6] sm:$0xff]  ;;  %v52_v2 = vld [vmem:[#allocation6 + $0x8] sm:$0xff] }
  0x27   :  { %46 = vst.msk [vmem:[#allocation2 + $0x8] sm:$0xff] %vm44_vm0, %v263_v0  ;;  %45 = vst.msk [vmem:[#allocation2] sm:$0xff] %vm44_vm0, %v263_v0  ;;  %v49_v3 = vld [vmem:[#allocation3] sm:$0xff]  ;;  %v177_v4 = vpack.c.bf16 %v52_v2, %v51_v1  ;;  %v50_v5 = vld [vmem:[#allocation3 + $0x8] sm:$0xff]  ;;  %s264_s1 = smov [#allocation8]  }
  0x28   :  { %174 = vmatprep.mubr.msk.f32.mxu0 %vm44_vm0, %v49_v3  ;;  %s151_s6 = sshll.u32 %s264_s1, 4  ;;  %s152_s6 = int_to_ptr.vmem [resolvable:$true] %s151_s6 }
  0x29   :  { %178 = vmatprep.subr.bf16.mxu0 %v177_v4  ;;  %s231_s7 = scalar_lea.vmem %s152_s6, 256  ;;  %p236_p3 = scmp.lt.s32.totalorder %s152_s6, %s152_s6 }
  0x2a   :  { %180 = vmatpush3.bf16.msra.mxu0 %v177_v4  ;;  %p232_p2 = scmp.ne.s32.totalorder %s152_s6, %s231_s7  ;;  %p237_p4 = scmp.lt.s32.totalorder %s231_s7, %s231_s7 }
  0x2c   :  { %p238_p5 = por %p237_p4, %p236_p3 }
  0x2d   :  { %175 = vmatmul.mubr.msk.f32.vlgmr.msra.gmra.mrb[0].mxu0 %vm44_vm0, %v50_v5 }
  0x2e   :  { %v48_v6 = vld [vmem:[#allocation2 + $0x8] sm:$0xff]  ;;  %v47_v7 = vld [vmem:[#allocation2] sm:$0xff]  ;;  %p239_p6 = pnand %p238_p5, %p232_p2 }
 0x100   :  { %v176_v8 = vpop.f32.mrb[0].mxu0 }
 0x101   :  { %v136_v9 = vadd.f32 %v176_v8, %v48_v6  ;;  %v126_v10 = vpop.f32.mrb[1].mxu0 }
 0x102   :  { %v135_v11 = vadd.f32 %v126_v10, %v47_v7 }
 0x103   :  { %138 = vst.msk [vmem:[#allocation2 + $0x8] sm:$0xff] %vm44_vm0, %v136_v9 }
 0x104   :  { %137 = vst.msk [vmem:[#allocation2] sm:$0xff] %vm44_vm0, %v135_v11 }
 0x10a   :  { %v143_v12 = vld [vmem:[#allocation2 + $0x8] sm:$0xff] }
 0x10b   :  { %v142_v13 = vld [vmem:[#allocation2] sm:$0xff]  ;;  %145 = vst.msk [vmem:[#allocation8 + $0x8] sm:$0xff] %vm44_vm0, %v143_v12 }
 0x10c   :  { %144 = vst.msk [vmem:[#allocation8] sm:$0xff] %vm44_vm0, %v142_v13 }
 0x10d   :  { %242 = shalt.err (!%p239_p6)
}
 0x10e   :  { %s243_s10 = scalar_lea.hbm %s335_s2, 256 }
 0x10f   :  { %p244_p7 = scmp.ne.s32.totalorder %s335_s2, %s243_s10  ;;  %p247_p8 = scmp.lt.u32.totalorder %s243_s10, %s335_s2 }
 0x111   :  { %p249_p9 = pnand %p247_p8, %p244_p7 }
 0x113   :  { %252 = shalt.err (!%p249_p9)
}
 0x114   :  { %157 = dma.vmem_to_hbm [thread:$0]  %s152_s6, 256, %s335_s2, [#allocation5], %s260_s19, %s260_s19, %s261_s20  }
 0x115   :  { %257 = dma.done.wait [#allocation5], 256  }
 0x116   :  { %258 = vsyncadd [#allocation5], 4294967040 }
 0x117   :  { %161 = vsyncpa [#allocation4], 1 }
 0x118   :  { %162 = vsyncpa [#allocation7], 1 }
 0x119   :  { %163 = vsyncpa [#allocation5], 1 }

</bundles_post_ra>
